<compile_context>
chip_gen: v7x
topology: tpu7x:2x2x1
jax: 0.10.0
libtpu: 0.0.40
codegen_flags: <defaults>
</compile_context>

<pallas_src>
import functools

import jax
import jax.numpy as jnp
from jax import lax
from jax.experimental import pallas as pl
from jax.experimental.pallas import tpu as pltpu


def _round_up(x, m):
    return (x + m - 1) // m * m


# ----------------------------------------------------------------------------
# Kernel 1: tiled GEMM (patches @ weight) + fused per-channel sum / sum-of-sq
# ----------------------------------------------------------------------------
def _gemm_stats_kernel(p_ref, w_ref, o_ref, stats_ref, acc_ref):
    kk = pl.program_id(2)

    @pl.when(kk == 0)
    def _():
        acc_ref[...] = jnp.zeros_like(acc_ref)

    acc_ref[...] += jnp.dot(p_ref[...], w_ref[...],
                            preferred_element_type=jnp.float32)

    @pl.when(kk == pl.num_programs(2) - 1)
    def _():
        acc = acc_ref[...]                                   # (tm, tn) f32
        o_ref[...] = acc
        s = jnp.sum(acc, axis=0, keepdims=True)              # (1, tn)
        ss = jnp.sum(acc * acc, axis=0, keepdims=True)       # (1, tn)
        row = lax.broadcasted_iota(jnp.int32, (8, acc.shape[1]), 0)
        # row 0 = partial sum, row 1 = partial sum of squares, rest zero.
        stats_ref[0] = jnp.where(row == 0, s, jnp.where(row == 1, ss, 0.0))


# ----------------------------------------------------------------------------
# Kernel 2: BN affine + LeakyReLU with fused (spatial, C) -> (C, spatial) store
# ----------------------------------------------------------------------------
def _bn_lrelu_t_kernel(x_ref, scale_ref, shift_ref, o_ref):
    y = x_ref[0] * scale_ref[...] + shift_ref[...]           # (ts, Cout_p)
    y = jnp.where(y > 0, y, jnp.float32(0.01) * y)           # LeakyReLU(0.01)
    o_ref[0] = y.T                                           # (Cout_p, ts)


# ----------------------------------------------------------------------------
# im2col (XLA side): (N, Cin, H, W) -> (N, Ho*Wo, Cin*k*k), K ordered (Cin,kh,kw)
# ----------------------------------------------------------------------------
def _im2col(x, k, stride, pad):
    n, cin, h, w = x.shape
    ho = (h + 2 * pad - k) // stride + 1
    wo = (w + 2 * pad - k) // stride + 1
    xp = jnp.pad(x, ((0, 0), (0, 0), (pad, pad), (pad, pad)))
    cols = []
    for kh in range(k):
        for kw in range(k):
            cols.append(xp[:, :, kh:kh + ho * stride:stride,
                           kw:kw + wo * stride:stride])       # (N,Cin,Ho,Wo)
    stacked = jnp.stack(cols, axis=0).reshape(k, k, n, cin, ho, wo)
    pat = stacked.transpose(2, 4, 5, 3, 0, 1).reshape(n, ho * wo, cin * k * k)
    return pat, ho, wo


# ----------------------------------------------------------------------------
# Wrapper
# ----------------------------------------------------------------------------
@functools.partial(jax.jit, static_argnames=("kernel_size", "stride"))
def conv_bn_lrelu(x, weight, bias, gamma, beta, *, kernel_size, stride=1):
    """x: (N,Cin,H,W) f32; weight: (Cout,Cin,k,k); bias/gamma/beta: (Cout,)
    returns (N,Cout,Ho,Wo) f32 (matches PyTorch Conv->BN(train)->LeakyReLU)."""
    n, cin, h, w = x.shape
    cout = weight.shape[0]
    k = kernel_size
    pad = (k - 1) // 2

    patches, ho, wo = _im2col(x, k, stride, pad)             # (N, HoWo, Kdim)
    howo = ho * wo
    kdim = cin * k * k

    # ---- alignment / padding (lane-dense 128-multiples on Cout and K) ------
    cout_p = _round_up(cout, 128)
    kdim_p = _round_up(kdim, 128)

    # Spatial tile: sublane dim of the GEMM, lane dim of the NCHW store.
    if howo % 512 == 0:
        ts = 512
    elif howo % 256 == 0:
        ts = 256
    elif howo >= 128:
        ts = 128
    else:
        ts = _round_up(howo, 8)
    howo_p = _round_up(howo, ts)

    tm = ts
    tn = 256 if cout_p % 256 == 0 else 128
    tk = 256 if kdim_p % 256 == 0 else 128

    patches_p = jnp.pad(patches,
                        ((0, 0), (0, howo_p - howo), (0, kdim_p - kdim)))
    patches_2d = patches_p.reshape(n * howo_p, kdim_p)       # (M_p, Kdim_p)
    w2d = jnp.pad(weight.reshape(cout, kdim).T,
                  ((0, kdim_p - kdim), (0, cout_p - cout)))  # (Kdim_p, Cout_p)

    m_p = n * howo_p
    gm, gn, gk = m_p // tm, cout_p // tn, kdim_p // tk

    conv_raw, stats = pl.pallas_call(
        _gemm_stats_kernel,
        out_shape=(jax.ShapeDtypeStruct((m_p, cout_p), jnp.float32),
                   jax.ShapeDtypeStruct((gm, 8, cout_p), jnp.float32)),
        grid_spec=pltpu.PrefetchScalarGridSpec(
            num_scalar_prefetch=0,
            grid=(gm, gn, gk),
            in_specs=[
                pl.BlockSpec((tm, tk), lambda i, j, kk: (i, kk)),
                pl.BlockSpec((tk, tn), lambda i, j, kk: (kk, j)),
            ],
            out_specs=[
                pl.BlockSpec((tm, tn), lambda i, j, kk: (i, j)),
                pl.BlockSpec((1, 8, tn), lambda i, j, kk: (i, 0, j)),
            ],
            scratch_shapes=[pltpu.VMEM((tm, tn), jnp.float32)],
        ),
        compiler_params=pltpu.CompilerParams(
            dimension_semantics=("parallel", "parallel", "arbitrary"),
            vmem_limit_bytes=32 * 1024 * 1024,   # fits v7x's 64 MiB comfortably
        ),
    )(patches_2d, w2d)

    # ---- batch statistics from the tiny (gm, 8, Cout) partials -------------
    count = jnp.float32(n * howo)                  # real (unpadded) elements
    sums = jnp.sum(stats[:, 0, :cout], axis=0)
    sumsq = jnp.sum(stats[:, 1, :cout], axis=0)
    mean_raw = sums / count                        # mean of bias-free GEMM
    var = jnp.maximum(sumsq / count - mean_raw * mean_raw, 0.0)
    eps = jnp.float32(1e-5)
    scale = gamma / jnp.sqrt(var + eps)            # bias doesn't change var
    shift = beta - scale * mean_raw                # conv bias cancels exactly

    scale_p = jnp.zeros((1, cout_p), jnp.float32).at[0, :cout].set(scale)
    shift_p = jnp.zeros((1, cout_p), jnp.float32).at[0, :cout].set(shift)

    # ---- fused affine + LeakyReLU + transposed (NCHW) store -----------------
    conv3 = conv_raw.reshape(n, howo_p, cout_p)    # free row-major reshape
    y = pl.pallas_call(
        _bn_lrelu_t_kernel,
        out_shape=jax.ShapeDtypeStruct((n, cout_p, howo_p), jnp.float32),
        grid_spec=pltpu.PrefetchScalarGridSpec(
            num_scalar_prefetch=0,
            grid=(n, howo_p // ts),
            in_specs=[
                pl.BlockSpec((1, ts, cout_p), lambda b, s: (b, s, 0)),
                pl.BlockSpec((1, cout_p), lambda b, s: (0, 0)),
                pl.BlockSpec((1, cout_p), lambda b, s: (0, 0)),
            ],
            out_specs=pl.BlockSpec((1, cout_p, ts), lambda b, s: (b, 0, s)),
        ),
        compiler_params=pltpu.CompilerParams(
            dimension_semantics=("parallel", "parallel"),
            vmem_limit_bytes=32 * 1024 * 1024,
        ),
    )(conv3, scale_p, shift_p)

    # crop channel/spatial padding; final reshape is free (row-major).
    return y[:, :cout, :howo].reshape(n, cout, ho, wo)


# ----------------------------------------------------------------------------
# Pure-JAX reference (correctness check)
# ----------------------------------------------------------------------------
def _reference(x, weight, bias, gamma, beta, kernel_size, stride):
    pad = (kernel_size - 1) // 2
    conv = lax.conv_general_dilated(
        x, weight, window_strides=(stride, stride),
        padding=[(pad, pad), (pad, pad)],
        dimension_numbers=("NCHW", "OIHW", "NCHW"),
    ) + bias.reshape(1, -1, 1, 1)
    mean = jnp.mean(conv, axis=(0, 2, 3), keepdims=True)
    var = jnp.var(conv, axis=(0, 2, 3), keepdims=True)
    bn = (conv - mean) / jnp.sqrt(var + 1e-5) * gamma.reshape(1, -1, 1, 1) \
         + beta.reshape(1, -1, 1, 1)
    return jnp.where(bn > 0, bn, 0.01 * bn)


if __name__ == "__main__":
    key = jax.random.PRNGKey(0)
    k_x, k_w, k_b, k_g, k_be = jax.random.split(key, 5)

    N, Cin, H, W = 2, 4, 16, 16
    Cout = 8

    x = jax.random.normal(k_x, (N, Cin, H, W), jnp.float32)
    bias = jax.random.normal(k_b, (Cout,), jnp.float32) * 0.1
    gamma = 1.0 + 0.1 * jax.random.normal(k_g, (Cout,), jnp.float32)
    beta = 0.1 * jax.random.normal(k_be, (Cout,), jnp.float32)

    for (K, stride) in [(3, 1), (3, 2)]:
        weight = jax.random.normal(k_w, (Cout, Cin, K, K), jnp.float32) * 0.1
        out = conv_bn_lrelu(x, weight, bias, gamma, beta,
                            kernel_size=K, stride=stride)
        out = jax.block_until_ready(out)

        ref = _reference(x, weight, bias, gamma, beta, K, stride)
        assert out.shape == ref.shape, (out.shape, ref.shape)
        assert jnp.allclose(out, ref, atol=3e-4, rtol=3e-4), \
            f"mismatch vs reference (k={K}, stride={stride})"

    print("KERNEL_OK")
</pallas_src>

<mosaic_0001>
module attributes {stable_mosaic.version = 11 : i64} {
  func.func @_gemm_stats_kernel(%arg0: i32, %arg1: i32, %arg2: i32, %arg3: memref<256x128xf32, #tpu.memory_space<vmem>>, %arg4: memref<128x128xf32, #tpu.memory_space<vmem>>, %arg5: memref<256x128xf32, #tpu.memory_space<vmem>>, %arg6: memref<1x8x128xf32, #tpu.memory_space<vmem>>, %arg7: memref<256x128xf32, #tpu.memory_space<vmem>>) attributes {dimension_semantics = [#tpu.dimension_semantics<parallel>, #tpu.dimension_semantics<parallel>, #tpu.dimension_semantics<arbitrary>], iteration_bounds = array<i64: 2, 1, 1>, scalar_prefetch = 0 : i64, scratch_operands = 1 : i64, tpu.core_type = #tpu.core_type<tc>, window_params = [{transform_indices = @transform_0, window_bounds = array<i64: 256, 128>}, {transform_indices = @transform_1, window_bounds = array<i64: 128, 128>}, {transform_indices = @transform_2, window_bounds = array<i64: 256, 128>}, {transform_indices = @transform_3, window_bounds = array<i64: 1, 8, 128>}]} {
    %c0_i32 = arith.constant 0 : i32
    %0 = arith.cmpi eq, %arg2, %c0_i32 : i32
    %1 = arith.extui %0 : i1 to i32
    %c0_i32_0 = arith.constant 0 : i32
    %2 = arith.cmpi ne, %1, %c0_i32_0 : i32
    scf.if %2 {
      %cst_10 = arith.constant 0.000000e+00 : f32
      %12 = vector.broadcast %cst_10 : f32 to vector<256x128xf32>
      %c0_11 = arith.constant 0 : index
      %c0_12 = arith.constant 0 : index
      %13 = vector.load %arg7[%c0_11, %c0_12] : memref<256x128xf32, #tpu.memory_space<vmem>>, vector<256x128xf32>
      tpu.vector_store %arg7[%c0_11, %c0_12], %12 {strides = array<i32>} : memref<256x128xf32, #tpu.memory_space<vmem>>, vector<256x128xf32>,
    } else {
    }
    %c0 = arith.constant 0 : index
    %c0_1 = arith.constant 0 : index
    %3 = vector.load %arg7[%c0, %c0_1] : memref<256x128xf32, #tpu.memory_space<vmem>>, vector<256x128xf32>
    %c0_2 = arith.constant 0 : index
    %c0_3 = arith.constant 0 : index
    %4 = vector.load %arg3[%c0_2, %c0_3] : memref<256x128xf32, #tpu.memory_space<vmem>>, vector<256x128xf32>
    %c0_4 = arith.constant 0 : index
    %c0_5 = arith.constant 0 : index
    %5 = vector.load %arg4[%c0_4, %c0_5] : memref<128x128xf32, #tpu.memory_space<vmem>>, vector<128x128xf32>
    %cst = arith.constant dense<0.000000e+00> : vector<256x128xf32>
    %6 = tpu.matmul %4, %5, %cst {dimension_numbers = #tpu.dot_dimension_numbers<[1], [0], [0], [1], [0, 0, 1, 1], [], []>} : vector<256x128xf32>, vector<128x128xf32>, vector<256x128xf32> -> vector<256x128xf32>
    %7 = arith.addf %3, %6 : vector<256x128xf32>
    %c0_6 = arith.constant 0 : index
    %c0_7 = arith.constant 0 : index
    %8 = vector.load %arg7[%c0_6, %c0_7] : memref<256x128xf32, #tpu.memory_space<vmem>>, vector<256x128xf32>
    tpu.vector_store %arg7[%c0_6, %c0_7], %7 {strides = array<i32>} : memref<256x128xf32, #tpu.memory_space<vmem>>, vector<256x128xf32>,
    %c0_i32_8 = arith.constant 0 : i32
    %9 = arith.cmpi eq, %arg2, %c0_i32_8 : i32
    %10 = arith.extui %9 : i1 to i32
    %c0_i32_9 = arith.constant 0 : i32
    %11 = arith.cmpi ne, %10, %c0_i32_9 : i32
    scf.if %11 {
      %c0_10 = arith.constant 0 : index
      %c0_11 = arith.constant 0 : index
      %12 = vector.load %arg7[%c0_10, %c0_11] : memref<256x128xf32, #tpu.memory_space<vmem>>, vector<256x128xf32>
      %c0_12 = arith.constant 0 : index
      %c0_13 = arith.constant 0 : index
      %13 = vector.load %arg5[%c0_12, %c0_13] : memref<256x128xf32, #tpu.memory_space<vmem>>, vector<256x128xf32>
      tpu.vector_store %arg5[%c0_12, %c0_13], %12 {strides = array<i32>} : memref<256x128xf32, #tpu.memory_space<vmem>>, vector<256x128xf32>,
      %cst_14 = arith.constant dense<0.000000e+00> : vector<128xf32>
      %14 = vector.multi_reduction <add>, %12, %cst_14 [0] : vector<256x128xf32> to vector<128xf32>
      %15 = vector.shape_cast %14 : vector<128xf32> to vector<1x128xf32>
      %16 = arith.mulf %12, %12 : vector<256x128xf32>
      %cst_15 = arith.constant dense<0.000000e+00> : vector<128xf32>
      %17 = vector.multi_reduction <add>, %16, %cst_15 [0] : vector<256x128xf32> to vector<128xf32>
      %18 = vector.shape_cast %17 : vector<128xf32> to vector<1x128xf32>
      %19 = tpu.iota {dimensions = array<i32: 0>} : vector<8x128xi32>
      %c0_i32_16 = arith.constant 0 : i32
      %20 = vector.broadcast %c0_i32_16 : i32 to vector<8x128xi32>
      %21 = arith.cmpi eq, %19, %20 : vector<8x128xi32>
      %c1_i32 = arith.constant 1 : i32
      %22 = vector.broadcast %c1_i32 : i32 to vector<8x128xi32>
      %23 = arith.cmpi eq, %19, %22 : vector<8x128xi32>
      %cst_17 = arith.constant 0.000000e+00 : f32
      %24 = vector.shape_cast %18 : vector<1x128xf32> to vector<1x128xf32>
      %25 = vector.broadcast %24 : vector<1x128xf32> to vector<8x128xf32>
      %26 = vector.broadcast %cst_17 : f32 to vector<8x128xf32>
      %27 = arith.select %23, %25, %26 : vector<8x128xi1>, vector<8x128xf32>
      %28 = vector.shape_cast %15 : vector<1x128xf32> to vector<1x128xf32>
      %29 = vector.broadcast %28 : vector<1x128xf32> to vector<8x128xf32>
      %30 = arith.select %21, %29, %27 : vector<8x128xi1>, vector<8x128xf32>
      %c0_18 = arith.constant 0 : index
      %c0_19 = arith.constant 0 : index
      %c0_20 = arith.constant 0 : index
      %31 = vector.load %arg6[%c0_18, %c0_19, %c0_20] : memref<1x8x128xf32, #tpu.memory_space<vmem>>, vector<1x8x128xf32>
      %32 = vector.shape_cast %31 : vector<1x8x128xf32> to vector<8x128xf32>
      %33 = vector.shape_cast %30 : vector<8x128xf32> to vector<1x8x128xf32>
      tpu.vector_store %arg6[%c0_18, %c0_19, %c0_20], %33 {strides = array<i32>} : memref<1x8x128xf32, #tpu.memory_space<vmem>>, vector<1x8x128xf32>,
    } else {
    }
    return
  }
  func.func @transform_0(%arg0: i32, %arg1: i32, %arg2: i32) -> (i32, i32) {
    %c0_i32 = arith.constant 0 : i32
    return %arg0, %arg2 : i32, i32
  }
  func.func @transform_1(%arg0: i32, %arg1: i32, %arg2: i32) -> (i32, i32) {
    %c0_i32 = arith.constant 0 : i32
    return %arg2, %arg1 : i32, i32
  }
  func.func @transform_2(%arg0: i32, %arg1: i32, %arg2: i32) -> (i32, i32) {
    %c0_i32 = arith.constant 0 : i32
    return %arg0, %arg1 : i32, i32
  }
  func.func @transform_3(%arg0: i32, %arg1: i32, %arg2: i32) -> (i32, i32, i32) {
    %c0_i32 = arith.constant 0 : i32
    %c0_i32_0 = arith.constant 0 : i32
    return %arg0, %c0_i32, %arg1 : i32, i32, i32
  }
}

module attributes {stable_mosaic.version = 11 : i64} {
  func.func @_bn_lrelu_t_kernel(%arg0: i32, %arg1: i32, %arg2: memref<1x256x128xf32, #tpu.memory_space<vmem>>, %arg3: memref<1x128xf32, #tpu.memory_space<vmem>>, %arg4: memref<1x128xf32, #tpu.memory_space<vmem>>, %arg5: memref<1x128x256xf32, #tpu.memory_space<vmem>>) attributes {dimension_semantics = [#tpu.dimension_semantics<parallel>, #tpu.dimension_semantics<parallel>], iteration_bounds = array<i64: 2, 1>, scalar_prefetch = 0 : i64, scratch_operands = 0 : i64, tpu.core_type = #tpu.core_type<tc>, window_params = [{transform_indices = @transform_0, window_bounds = array<i64: 1, 256, 128>}, {pipeline_mode = #tpu.pipeline_mode<synchronous>, transform_indices = @transform_1, window_bounds = array<i64: 1, 128>}, {pipeline_mode = #tpu.pipeline_mode<synchronous>, transform_indices = @transform_2, window_bounds = array<i64: 1, 128>}, {transform_indices = @transform_3, window_bounds = array<i64: 1, 128, 256>}]} {
    %c0 = arith.constant 0 : index
    %c0_0 = arith.constant 0 : index
    %c0_1 = arith.constant 0 : index
    %0 = vector.load %arg2[%c0, %c0_0, %c0_1] : memref<1x256x128xf32, #tpu.memory_space<vmem>>, vector<1x256x128xf32>
    %1 = vector.shape_cast %0 : vector<1x256x128xf32> to vector<256x128xf32>
    %c0_2 = arith.constant 0 : index
    %c0_3 = arith.constant 0 : index
    %2 = vector.load %arg3[%c0_2, %c0_3] : memref<1x128xf32, #tpu.memory_space<vmem>>, vector<1x128xf32>
    %3 = vector.broadcast %2 : vector<1x128xf32> to vector<256x128xf32>
    %4 = arith.mulf %1, %3 : vector<256x128xf32>
    %c0_4 = arith.constant 0 : index
    %c0_5 = arith.constant 0 : index
    %5 = vector.load %arg4[%c0_4, %c0_5] : memref<1x128xf32, #tpu.memory_space<vmem>>, vector<1x128xf32>
    %6 = vector.broadcast %5 : vector<1x128xf32> to vector<256x128xf32>
    %7 = arith.addf %4, %6 : vector<256x128xf32>
    %cst = arith.constant 0.000000e+00 : f32
    %8 = vector.broadcast %cst : f32 to vector<256x128xf32>
    %9 = arith.cmpf ogt, %7, %8 : vector<256x128xf32>
    %cst_6 = arith.constant 0.00999999977 : f32
    %10 = vector.broadcast %cst_6 : f32 to vector<256x128xf32>
    %11 = arith.mulf %10, %7 : vector<256x128xf32>
    %12 = arith.select %9, %7, %11 : vector<256x128xi1>, vector<256x128xf32>
    %13 = tpu.transpose %12, [1, 0] : vector<256x128xf32> -> vector<128x256xf32>
    %c0_7 = arith.constant 0 : index
    %c0_8 = arith.constant 0 : index
    %c0_9 = arith.constant 0 : index
    %14 = vector.load %arg5[%c0_7, %c0_8, %c0_9] : memref<1x128x256xf32, #tpu.memory_space<vmem>>, vector<1x128x256xf32>
    %15 = vector.shape_cast %14 : vector<1x128x256xf32> to vector<128x256xf32>
    %16 = vector.shape_cast %13 : vector<128x256xf32> to vector<1x128x256xf32>
    tpu.vector_store %arg5[%c0_7, %c0_8, %c0_9], %16 {strides = array<i32>} : memref<1x128x256xf32, #tpu.memory_space<vmem>>, vector<1x128x256xf32>,
    return
  }
  func.func @transform_0(%arg0: i32, %arg1: i32) -> (i32, i32, i32) {
    %c0_i32 = arith.constant 0 : i32
    %c0_i32_0 = arith.constant 0 : i32
    return %arg0, %arg1, %c0_i32 : i32, i32, i32
  }
  func.func @transform_1(%arg0: i32, %arg1: i32) -> (i32, i32) {
    %c0_i32 = arith.constant 0 : i32
    %c0_i32_0 = arith.constant 0 : i32
    %c0_i32_1 = arith.constant 0 : i32
    return %c0_i32, %c0_i32_0 : i32, i32
  }
  func.func @transform_2(%arg0: i32, %arg1: i32) -> (i32, i32) {
    %c0_i32 = arith.constant 0 : i32
    %c0_i32_0 = arith.constant 0 : i32
    %c0_i32_1 = arith.constant 0 : i32
    return %c0_i32, %c0_i32_0 : i32, i32
  }
  func.func @transform_3(%arg0: i32, %arg1: i32) -> (i32, i32, i32) {
    %c0_i32 = arith.constant 0 : i32
    %c0_i32_0 = arith.constant 0 : i32
    return %arg0, %c0_i32, %arg1 : i32, i32, i32
  }
}

</mosaic_0001>

<bundles_post_ra>
// kernel: conv_bn_lrelu.3
= control target key start
LH: loop header
LB: loop body
LE: loop exit
PB: predicated region body
PF: predicated region fallthrough
CT: control target
= control target key end

     0   :  { %s682_s12 = smov 0   ;;  %s684_s13 = smov 0   ;;  %s864_s0 = inlined_call_operand.vmem [shape: f32[2,256,128], index: 0, kind: input, shape index: {}]   ;;  %s865_s1 = inlined_call_operand.vmem [shape: f32[1,128], index: 1, kind: input, shape index: {}]   ;;  %s866_s2 = inlined_call_operand.vmem [shape: f32[1,128], index: 2, kind: input, shape index: {}]   ;;  %s867_s3 = inlined_call_operand.vmem [shape: f32[2,128,256], index: 3, kind: output, shape index: {}]  }
   0x1   :  { %s686_s14 = smov 0  }
   0x2 LB: > { %s25_s15 = sadd.s32 1, %s656_s13  ;;  %p603_p0 = scmp.ge.s32.totalorder %s660_s14, 1  ;;  %s660_s14 = sphi %s686_s14, %s13_s14   ;;  %s656_s13 = sphi %s684_s13, %s869_s13   ;;  %s652_s12 = sphi %s682_s12, %s868_s12  }
   0x3   : > { %p27_p1 = scmp.ge.s32.totalorder %s25_s15, 2  ;;  %p158_p2 = scmp.lt.s32.totalorder %s660_s14, 3 }
   0x5   : > { %s871_s15 = smov (%p27_p1, %s25_s15), 0  ;;  %p159_p3 = pnand %p603_p0, %p158_p2 }
   0x6   : > { %p191_p4 = scmp.lt.s32.totalorder (!%p159_p3), %s652_s12, 1  ;;  %v706_v0 = vld [vmem:[%s865_s1] ss:$0 sm:$0xff] (!%p159_p3) }
   0x7   : > { %162 = sbr.rel (%p159_p3) target bundleno = 216 (0xd8), region = 32  ;;  %v718_v1 = vld [vmem:[%s866_s2] ss:$0 sm:$0xff] (!%p159_p3) }
   0xe   : > { %s873_s12 = smov (!%p191_p4, %s652_s12), 1 }
   0xf   : > { %s612_s16 = sshll.u32 %s873_s12, 8 }
  0x10   : > { %s713_s21 = scalar_lea.vmem %s864_s0, %s612_s16  ;;  %s821_s26 = scalar_lea.vmem %s867_s3, %s612_s16 }
  0x11   : > { %v226_v2 = vld [vmem:[%s713_s21 + $0x80] sm:$0xff]  ;;  %v227_v4 = vld [vmem:[%s713_s21 + $0x88] sm:$0xff]  ;;  %v228_v9 = vld [vmem:[%s713_s21 + $0x90] sm:$0xff] }
  0x12   : > { %v210_v3 = vld [vmem:[%s713_s21] sm:$0xff]  ;;  %v265_v5 = vmul.f32 %v706_v0, %v226_v2  ;;  %v266_v7 = vmul.f32 %v706_v0, %v227_v4  ;;  %v211_v8 = vld [vmem:[%s713_s21 + $0x8] sm:$0xff]  ;;  %v212_v10 = vld [vmem:[%s713_s21 + $0x10] sm:$0xff]  ;;  %v267_v12 = vmul.f32 %v706_v0, %v228_v9 }
  0x13   : > { %v249_v6 = vmul.f32 %v706_v0, %v210_v3  ;;  %v250_v11 = vmul.f32 %v706_v0, %v211_v8  ;;  %v251_v13 = vmul.f32 %v706_v0, %v212_v10  ;;  %v229_v14 = vld [vmem:[%s713_s21 + $0x98] sm:$0xff]  ;;  %v230_v24 = vld [vmem:[%s713_s21 + $0xa0] sm:$0xff]  ;;  %v231_v36 = vld [vmem:[%s713_s21 + $0xa8] sm:$0xff] }
  0x14   : > { %v213_v15 = vld [vmem:[%s713_s21 + $0x18] sm:$0xff]  ;;  %v304_v16 = vadd.f32 %v718_v1, %v265_v5  ;;  %v305_v18 = vadd.f32 %v718_v1, %v266_v7  ;;  %v268_v19 = vmul.f32 %v706_v0, %v229_v14  ;;  %v306_v21 = vadd.f32 %v718_v1, %v267_v12  ;;  %v214_v32 = vld [vmem:[%s713_s21 + $0x20] sm:$0xff]  ;;  %v215_v40 = vld [vmem:[%s713_s21 + $0x28] sm:$0xff] }
  0x15   : > { %v288_v17 = vadd.f32 %v718_v1, %v249_v6  ;;  %v289_v20 = vadd.f32 %v718_v1, %v250_v11  ;;  %v290_v22 = vadd.f32 %v718_v1, %v251_v13  ;;  %v252_v23 = vmul.f32 %v706_v0, %v213_v15  ;;  %v232_v50 = vld [vmem:[%s713_s21 + $0xb0] sm:$0xff]  ;;  %v233_v60 = vld [vmem:[%s713_s21 + $0xb8] sm:$0xff]  ;;  %v234_v4 = vld [vmem:[%s713_s21 + $0xc0] sm:$0xff] }
  0x16   : > { %vm336_vm0 = vcmp.gt.f32.partialorder %v304_v16, 0.0  ;;  %v368_v25 = vmul.f32 0.01, %v304_v16  ;;  %vm337_vm2 = vcmp.gt.f32.partialorder %v305_v18, 0.0  ;;  %v369_v27 = vmul.f32 0.01, %v305_v18 }
  0x17   : > { %vm320_vm1 = vcmp.gt.f32.partialorder %v288_v17, 0.0  ;;  %v352_v26 = vmul.f32 0.01, %v288_v17  ;;  %vm321_vm3 = vcmp.gt.f32.partialorder %v289_v20, 0.0  ;;  %v353_v28 = vmul.f32 0.01, %v289_v20 }
  0x18   : > { %v400_v29 = vsel %vm336_vm0, %v304_v16, %v368_v25  ;;  %v370_v31 = vmul.f32 0.01, %v306_v21  ;;  %v401_v33 = vsel %vm337_vm2, %v305_v18, %v369_v27  ;;  %vm338_vm4 = vcmp.gt.f32.partialorder %v306_v21, 0.0  ;;  %v216_v51 = vld [vmem:[%s713_s21 + $0x30] sm:$0xff]  ;;  %v217_v61 = vld [vmem:[%s713_s21 + $0x38] sm:$0xff]  ;;  %v218_v9 = vld [vmem:[%s713_s21 + $0x40] sm:$0xff] }
  0x19   : > { %v384_v30 = vsel %vm320_vm1, %v288_v17, %v352_v26  ;;  %448 = vxpose.xlu1.b32.start [1/16] %v400_v29, 128  ;;  %v385_v34 = vsel %vm321_vm3, %v289_v20, %v353_v28  ;;  %v354_v35 = vmul.f32 0.01, %v290_v22  ;;  %vm322_vm5 = vcmp.gt.f32.partialorder %v290_v22, 0.0  ;;  %v235_v15 = vld [vmem:[%s713_s21 + $0xc8] sm:$0xff]  ;;  %v236_v28 = vld [vmem:[%s713_s21 + $0xd0] sm:$0xff] }
  0x1a   : > { %416 = vxpose.xlu0.b32.start [1/16] %v384_v30, 128  ;;  %v307_v37 = vadd.f32 %v718_v1, %v268_v19  ;;  %v291_v38 = vadd.f32 %v718_v1, %v252_v23  ;;  %v269_v39 = vmul.f32 %v706_v0, %v230_v24  ;;  %v253_v41 = vmul.f32 %v706_v0, %v214_v32  ;;  %v219_v19 = vld [vmem:[%s713_s21 + $0x48] sm:$0xff]  ;;  %v220_v29 = vld [vmem:[%s713_s21 + $0x50] sm:$0xff] }
  0x1b   : > { %v402_v42 = vsel %vm338_vm4, %v306_v21, %v370_v31  ;;  %v270_v43 = vmul.f32 %v706_v0, %v231_v36  ;;  %v386_v44 = vsel %vm322_vm5, %v290_v22, %v354_v35  ;;  %v254_v47 = vmul.f32 %v706_v0, %v215_v40 }
  0x1c   : > { %v371_v45 = vmul.f32 0.01, %v307_v37  ;;  %v355_v46 = vmul.f32 0.01, %v291_v38  ;;  %vm339_vm6 = vcmp.gt.f32.partialorder %v307_v37, 0.0  ;;  %vm323_vm7 = vcmp.gt.f32.partialorder %v291_v38, 0.0 }
  0x1d   : > { %449 = vxpose.xlu1.b32.cont [2/16] %v401_v33, 128  ;;  %v308_v48 = vadd.f32 %v718_v1, %v269_v39  ;;  %v292_v49 = vadd.f32 %v718_v1, %v253_v41  ;;  %v309_v52 = vadd.f32 %v718_v1, %v270_v43  ;;  %v271_v55 = vmul.f32 %v706_v0, %v232_v50  ;;  %v221_v39 = vld [vmem:[%s713_s21 + $0x58] sm:$0xff] }
  0x1e   : > { %417 = vxpose.xlu0.b32.cont [2/16] %v385_v34, 128  ;;  %v403_v53 = vsel %vm339_vm6, %v307_v37, %v371_v45  ;;  %v387_v54 = vsel %vm323_vm7, %v291_v38, %v355_v46  ;;  %v293_v58 = vadd.f32 %v718_v1, %v254_v47  ;;  %v255_v59 = vmul.f32 %v706_v0, %v216_v51  ;;  %v237_v38 = vld [vmem:[%s713_s21 + $0xd8] sm:$0xff] }
  0x1f   : > { %v372_v56 = vmul.f32 0.01, %v308_v48  ;;  %v356_v57 = vmul.f32 0.01, %v292_v49  ;;  %vm340_vm8 = vcmp.gt.f32.partialorder %v308_v48, 0.0  ;;  %vm324_vm9 = vcmp.gt.f32.partialorder %v292_v49, 0.0 }
  0x20   : > { %v373_v62 = vmul.f32 0.01, %v309_v52  ;;  %v310_v63 = vadd.f32 %v718_v1, %v271_v55  ;;  %v272_v2 = vmul.f32 %v706_v0, %v233_v60  ;;  %v256_v3 = vmul.f32 %v706_v0, %v217_v61 }
  0x21   : > { %450 = vxpose.xlu1.b32.cont [3/16] %v402_v42, 128  ;;  %v404_v5 = vsel %vm340_vm8, %v308_v48, %v372_v56  ;;  %v388_v6 = vsel %vm324_vm9, %v292_v49, %v356_v57  ;;  %v357_v7 = vmul.f32 0.01, %v293_v58  ;;  %v294_v8 = vadd.f32 %v718_v1, %v255_v59  ;;  %v222_v49 = vld [vmem:[%s713_s21 + $0x60] sm:$0xff]  ;;  %v223_v59 = vld [vmem:[%s713_s21 + $0x68] sm:$0xff] }
  0x22   : > { %418 = vxpose.xlu0.b32.cont [3/16] %v386_v44, 128  ;;  %vm341_vm10 = vcmp.gt.f32.partialorder %v309_v52, 0.0  ;;  %vm325_vm11 = vcmp.gt.f32.partialorder %v293_v58, 0.0  ;;  %v273_v10 = vmul.f32 %v706_v0, %v234_v4  ;;  %v374_v11 = vmul.f32 0.01, %v310_v63  ;;  %v238_v44 = vld [vmem:[%s713_s21 + $0xe0] sm:$0xff] }
  0x23   : > { %v311_v12 = vadd.f32 %v718_v1, %v272_v2  ;;  %v295_v13 = vadd.f32 %v718_v1, %v256_v3  ;;  %v257_v14 = vmul.f32 %v706_v0, %v218_v9  ;;  %v405_v16 = vsel %vm341_vm10, %v309_v52, %v373_v62 }
  0x24   : > { %v389_v17 = vsel %vm325_vm11, %v293_v58, %v357_v7  ;;  %vm342_vm12 = vcmp.gt.f32.partialorder %v310_v63, 0.0  ;;  %v358_v18 = vmul.f32 0.01, %v294_v8  ;;  %vm326_vm13 = vcmp.gt.f32.partialorder %v294_v8, 0.0  ;;  %v239_v58 = vld [vmem:[%s713_s21 + $0xe8] sm:$0xff]  ;;  %v224_v7 = vld [vmem:[%s713_s21 + $0x70] sm:$0xff] }
  0x25   : > { %451 = vxpose.xlu1.b32.cont [4/16] %v403_v53, 128  ;;  %v312_v20 = vadd.f32 %v718_v1, %v273_v10  ;;  %v274_v21 = vmul.f32 %v706_v0, %v235_v15  ;;  %v406_v22 = vsel %vm342_vm12, %v310_v63, %v374_v11  ;;  %v375_v23 = vmul.f32 0.01, %v311_v12 }
  0x26   : > { %419 = vxpose.xlu0.b32.cont [4/16] %v387_v54, 128  ;;  %v359_v24 = vmul.f32 0.01, %v295_v13  ;;  %v296_v25 = vadd.f32 %v718_v1, %v257_v14  ;;  %v390_v26 = vsel %vm326_vm13, %v294_v8, %v358_v18  ;;  %vm343_vm14 = vcmp.gt.f32.partialorder %v311_v12, 0.0 }
  0x27   : > { %vm327_vm15 = vcmp.gt.f32.partialorder %v295_v13, 0.0  ;;  %v258_v27 = vmul.f32 %v706_v0, %v219_v19  ;;  %vm344_vm0 = vcmp.gt.f32.partialorder %v312_v20, 0.0  ;;  %v376_v30 = vmul.f32 0.01, %v312_v20 }
  0x28   : > { %v407_v31 = vsel %vm343_vm14, %v311_v12, %v375_v23  ;;  %v391_v32 = vsel %vm327_vm15, %v295_v13, %v359_v24  ;;  %v360_v33 = vmul.f32 0.01, %v296_v25  ;;  %v313_v34 = vadd.f32 %v718_v1, %v274_v21 }
  0x29   : > { %452 = vxpose.xlu1.b32.cont [5/16] %v404_v5, 128  ;;  %vm328_vm1 = vcmp.gt.f32.partialorder %v296_v25, 0.0  ;;  %v297_v35 = vadd.f32 %v718_v1, %v258_v27  ;;  %v275_v36 = vmul.f32 %v706_v0, %v236_v28  ;;  %v259_v37 = vmul.f32 %v706_v0, %v220_v29 }
  0x2a   : > { %420 = vxpose.xlu0.b32.cont [5/16] %v388_v6, 128  ;;  %v408_v40 = vsel %vm344_vm0, %v312_v20, %v376_v30  ;;  %v392_v41 = vsel %vm328_vm1, %v296_v25, %v360_v33  ;;  %vm345_vm2 = vcmp.gt.f32.partialorder %v313_v34, 0.0  ;;  %v377_v42 = vmul.f32 0.01, %v313_v34  ;;  %v240_v6 = vld [vmem:[%s713_s21 + $0xf0] sm:$0xff] }
  0x2b   : > { %v276_v43 = vmul.f32 %v706_v0, %v237_v38  ;;  %v361_v45 = vmul.f32 0.01, %v297_v35  ;;  %v314_v46 = vadd.f32 %v718_v1, %v275_v36  ;;  %v298_v47 = vadd.f32 %v718_v1, %v259_v37 }
  0x2c   : > { %v260_v48 = vmul.f32 %v706_v0, %v221_v39  ;;  %vm329_vm3 = vcmp.gt.f32.partialorder %v297_v35, 0.0  ;;  %v277_v50 = vmul.f32 %v706_v0, %v238_v44  ;;  %v409_v51 = vsel %vm345_vm2, %v313_v34, %v377_v42 }
  0x2d   : > { %453 = vxpose.xlu1.b32.cont [6/16] %v405_v16, 128  ;;  %v315_v52 = vadd.f32 %v718_v1, %v276_v43  ;;  %v261_v53 = vmul.f32 %v706_v0, %v222_v49  ;;  %v393_v54 = vsel %vm329_vm3, %v297_v35, %v361_v45  ;;  %v378_v55 = vmul.f32 0.01, %v314_v46  ;;  %v241_v16 = vld [vmem:[%s713_s21 + $0xf8] sm:$0xff] }
  0x2e   : > { %421 = vxpose.xlu0.b32.cont [6/16] %v389_v17, 128  ;;  %v362_v56 = vmul.f32 0.01, %v298_v47  ;;  %v299_v57 = vadd.f32 %v718_v1, %v260_v48  ;;  %vm346_vm4 = vcmp.gt.f32.partialorder %v314_v46, 0.0  ;;  %vm330_vm5 = vcmp.gt.f32.partialorder %v298_v47, 0.0  ;;  %v225_v17 = vld [vmem:[%s713_s21 + $0x78] sm:$0xff] }
  0x2f   : > { %v316_v60 = vadd.f32 %v718_v1, %v277_v50  ;;  %vm347_vm6 = vcmp.gt.f32.partialorder %v315_v52, 0.0  ;;  %v379_v61 = vmul.f32 0.01, %v315_v52  ;;  %v300_v62 = vadd.f32 %v718_v1, %v261_v53 }
  0x30   : > { %v278_v63 = vmul.f32 %v706_v0, %v239_v58  ;;  %v410_v2 = vsel %vm346_vm4, %v314_v46, %v378_v55  ;;  %v394_v3 = vsel %vm330_vm5, %v298_v47, %v362_v56  ;;  %v363_v4 = vmul.f32 0.01, %v299_v57 }
  0x31   : > { %454 = vxpose.xlu1.b32.cont [7/16] %v406_v22, 128  ;;  %v262_v5 = vmul.f32 %v706_v0, %v223_v59  ;;  %vm331_vm7 = vcmp.gt.f32.partialorder %v299_v57, 0.0  ;;  %vm348_vm8 = vcmp.gt.f32.partialorder %v316_v60, 0.0  ;;  %v380_v8 = vmul.f32 0.01, %v316_v60 }
  0x32   : > { %422 = vxpose.xlu0.b32.cont [7/16] %v390_v26, 128  ;;  %v411_v9 = vsel %vm347_vm6, %v315_v52, %v379_v61  ;;  %v364_v10 = vmul.f32 0.01, %v300_v62  ;;  %v317_v11 = vadd.f32 %v718_v1, %v278_v63  ;;  %v279_v12 = vmul.f32 %v706_v0, %v240_v6 }
  0x33   : > { %v395_v13 = vsel %vm331_vm7, %v299_v57, %v363_v4  ;;  %vm332_vm9 = vcmp.gt.f32.partialorder %v300_v62, 0.0  ;;  %v301_v14 = vadd.f32 %v718_v1, %v262_v5  ;;  %v263_v15 = vmul.f32 %v706_v0, %v224_v7 }
  0x34   : > { %v412_v18 = vsel %vm348_vm8, %v316_v60, %v380_v8  ;;  %v396_v19 = vsel %vm332_vm9, %v300_v62, %v364_v10  ;;  %v381_v20 = vmul.f32 0.01, %v317_v11  ;;  %v318_v21 = vadd.f32 %v718_v1, %v279_v12 }
  0x35   : > { %455 = vxpose.xlu1.b32.cont [8/16] %v407_v31, 128  ;;  %v280_v22 = vmul.f32 %v706_v0, %v241_v16  ;;  %vm349_vm10 = vcmp.gt.f32.partialorder %v317_v11, 0.0  ;;  %v365_v23 = vmul.f32 0.01, %v301_v14  ;;  %v302_v24 = vadd.f32 %v718_v1, %v263_v15 }
  0x36   : > { %423 = vxpose.xlu0.b32.cont [8/16] %v391_v32, 128  ;;  %v264_v25 = vmul.f32 %v706_v0, %v225_v17  ;;  %vm333_vm11 = vcmp.gt.f32.partialorder %v301_v14, 0.0  ;;  %v413_v26 = vsel %vm349_vm10, %v317_v11, %v381_v20  ;;  %v382_v27 = vmul.f32 0.01, %v318_v21 }
  0x37   : > { %v397_v28 = vsel %vm333_vm11, %v301_v14, %v365_v23  ;;  %v366_v29 = vmul.f32 0.01, %v302_v24  ;;  %v319_v30 = vadd.f32 %v718_v1, %v280_v22  ;;  %vm350_vm12 = vcmp.gt.f32.partialorder %v318_v21, 0.0 }
  0x38   : > { %v303_v31 = vadd.f32 %v718_v1, %v264_v25  ;;  %vm334_vm13 = vcmp.gt.f32.partialorder %v302_v24, 0.0  ;;  %v414_v32 = vsel %vm350_vm12, %v318_v21, %v382_v27 }
  0x39   : > { %456 = vxpose.xlu1.b32.cont [9/16] %v408_v40, 128  ;;  %v398_v33 = vsel %vm334_vm13, %v302_v24, %v366_v29  ;;  %v383_v34 = vmul.f32 0.01, %v319_v30  ;;  %vm351_vm14 = vcmp.gt.f32.partialorder %v319_v30, 0.0 }
  0x3a   : > { %424 = vxpose.xlu0.b32.cont [9/16] %v392_v41, 128  ;;  %v367_v0 = vmul.f32 0.01, %v303_v31  ;;  %vm335_vm15 = vcmp.gt.f32.partialorder %v303_v31, 0.0 }
  0x3b   : > { %v415_v35 = vsel %vm351_vm14, %v319_v30, %v383_v34 }
  0x3c   : > { %v399_v36 = vsel %vm335_vm15, %v303_v31, %v367_v0 }
  0x3d   : > { %457 = vxpose.xlu1.b32.cont [10/16] %v409_v51, 128 }
  0x3e   : > { %425 = vxpose.xlu0.b32.cont [10/16] %v393_v54, 128 }
  0x41   : > { %458 = vxpose.xlu1.b32.cont [11/16] %v410_v2, 128 }
  0x42   : > { %426 = vxpose.xlu0.b32.cont [11/16] %v394_v3, 128 }
  0x45   : > { %459 = vxpose.xlu1.b32.cont [12/16] %v411_v9, 128 }
  0x46   : > { %427 = vxpose.xlu0.b32.cont [12/16] %v395_v13, 128 }
  0x49   : > { %460 = vxpose.xlu1.b32.cont [13/16] %v412_v18, 128 }
  0x4a   : > { %428 = vxpose.xlu0.b32.cont [13/16] %v396_v19, 128 }
  0x4d   : > { %461 = vxpose.xlu1.b32.cont [14/16] %v413_v26, 128 }
  0x4e   : > { %429 = vxpose.xlu0.b32.cont [14/16] %v397_v28, 128 }
  0x51   : > { %462 = vxpose.xlu1.b32.cont [15/16] %v414_v32, 128 }
  0x52   : > { %430 = vxpose.xlu0.b32.cont [15/16] %v398_v33, 128 }
  0x55   : > { %463 = vxpose.xlu1.b32.end [16/16] %v415_v35, 128 }
  0x56   : > { %431 = vxpose.xlu0.b32.end [16/16] %v399_v36, 128 }
  0x99   : > { %v464_v1 = vpop.trf.xlu1 }
  0x9a   : > { %v432_v37 = vpop.trf.xlu0  ;;  %481 = vst [vmem:[%s821_s26 + $0x8] sm:$0xff] %v464_v1 }
  0x9b   : > { %480 = vst [vmem:[%s821_s26] sm:$0xff] %v432_v37 }
  0x9d   : > { %v465_v38 = vpop.trf.xlu1 }
  0x9e   : > { %v433_v39 = vpop.trf.xlu0  ;;  %483 = vst [vmem:[%s821_s26 + $0x18] sm:$0xff] %v465_v38 }
  0x9f   : > { %482 = vst [vmem:[%s821_s26 + $0x10] sm:$0xff] %v433_v39 }
  0xa1   : > { %v466_v40 = vpop.trf.xlu1 }
  0xa2   : > { %v434_v41 = vpop.trf.xlu0  ;;  %485 = vst [vmem:[%s821_s26 + $0x28] sm:$0xff] %v466_v40 }
  0xa3   : > { %484 = vst [vmem:[%s821_s26 + $0x20] sm:$0xff] %v434_v41 }
  0xa5   : > { %v467_v42 = vpop.trf.xlu1 }
  0xa6   : > { %v435_v43 = vpop.trf.xlu0  ;;  %487 = vst [vmem:[%s821_s26 + $0x38] sm:$0xff] %v467_v42 }
  0xa7   : > { %486 = vst [vmem:[%s821_s26 + $0x30] sm:$0xff] %v435_v43 }
  0xa9   : > { %v468_v44 = vpop.trf.xlu1 }
  0xaa   : > { %v436_v45 = vpop.trf.xlu0  ;;  %489 = vst [vmem:[%s821_s26 + $0x48] sm:$0xff] %v468_v44 }
  0xab   : > { %488 = vst [vmem:[%s821_s26 + $0x40] sm:$0xff] %v436_v45 }
  0xad   : > { %v469_v46 = vpop.trf.xlu1 }
  0xae   : > { %v437_v47 = vpop.trf.xlu0  ;;  %491 = vst [vmem:[%s821_s26 + $0x58] sm:$0xff] %v469_v46 }
  0xaf   : > { %490 = vst [vmem:[%s821_s26 + $0x50] sm:$0xff] %v437_v47 }
  0xb1   : > { %v470_v48 = vpop.trf.xlu1 }
  0xb2   : > { %v438_v49 = vpop.trf.xlu0  ;;  %493 = vst [vmem:[%s821_s26 + $0x68] sm:$0xff] %v470_v48 }
  0xb3   : > { %492 = vst [vmem:[%s821_s26 + $0x60] sm:$0xff] %v438_v49 }
  0xb5   : > { %v471_v50 = vpop.trf.xlu1 }
  0xb6   : > { %v439_v51 = vpop.trf.xlu0  ;;  %495 = vst [vmem:[%s821_s26 + $0x78] sm:$0xff] %v471_v50 }
  0xb7   : > { %494 = vst [vmem:[%s821_s26 + $0x70] sm:$0xff] %v439_v51 }
  0xb9   : > { %v472_v52 = vpop.trf.xlu1 }
  0xba   : > { %v440_v53 = vpop.trf.xlu0  ;;  %497 = vst [vmem:[%s821_s26 + $0x88] sm:$0xff] %v472_v52 }
  0xbb   : > { %496 = vst [vmem:[%s821_s26 + $0x80] sm:$0xff] %v440_v53 }
  0xbd   : > { %v473_v54 = vpop.trf.xlu1 }
  0xbe   : > { %v441_v55 = vpop.trf.xlu0  ;;  %499 = vst [vmem:[%s821_s26 + $0x98] sm:$0xff] %v473_v54 }
  0xbf   : > { %498 = vst [vmem:[%s821_s26 + $0x90] sm:$0xff] %v441_v55 }
  0xc1   : > { %v474_v56 = vpop.trf.xlu1 }
  0xc2   : > { %v442_v57 = vpop.trf.xlu0  ;;  %501 = vst [vmem:[%s821_s26 + $0xa8] sm:$0xff] %v474_v56 }
  0xc3   : > { %500 = vst [vmem:[%s821_s26 + $0xa0] sm:$0xff] %v442_v57 }
  0xc5   : > { %v475_v58 = vpop.trf.xlu1 }
  0xc6   : > { %v443_v59 = vpop.trf.xlu0  ;;  %503 = vst [vmem:[%s821_s26 + $0xb8] sm:$0xff] %v475_v58 }
  0xc7   : > { %502 = vst [vmem:[%s821_s26 + $0xb0] sm:$0xff] %v443_v59 }
  0xc9   : > { %v476_v60 = vpop.trf.xlu1 }
  0xca   : > { %v444_v61 = vpop.trf.xlu0  ;;  %505 = vst [vmem:[%s821_s26 + $0xc8] sm:$0xff] %v476_v60 }
  0xcb   : > { %504 = vst [vmem:[%s821_s26 + $0xc0] sm:$0xff] %v444_v61 }
  0xcd   : > { %v477_v62 = vpop.trf.xlu1 }
  0xce   : > { %v445_v63 = vpop.trf.xlu0  ;;  %507 = vst [vmem:[%s821_s26 + $0xd8] sm:$0xff] %v477_v62 }
  0xcf   : > { %506 = vst [vmem:[%s821_s26 + $0xd0] sm:$0xff] %v445_v63 }
  0xd1   : > { %v478_v2 = vpop.trf.xlu1 }
  0xd2   : > { %v446_v3 = vpop.trf.xlu0  ;;  %509 = vst [vmem:[%s821_s26 + $0xe8] sm:$0xff] %v478_v2 }
  0xd3   : > { %508 = vst [vmem:[%s821_s26 + $0xe0] sm:$0xff] %v446_v3 }
  0xd5   : > { %v479_v4 = vpop.trf.xlu1 }
  0xd6   : > { %v447_v5 = vpop.trf.xlu0  ;;  %511 = vst [vmem:[%s821_s26 + $0xf8] sm:$0xff] %v479_v4 }
  0xd7   : > { %510 = vst [vmem:[%s821_s26 + $0xf0] sm:$0xff] %v447_v5 }
  0xd8 PF: > { %s13_s14 = sadd.s32 1, %s660_s14   ;;  %s868_s12 = smov %s656_s13 }
  0xd9   : > { %p10_p5 = scmp.ge.s32.totalorder %s13_s14, 4   ;;  %s869_s13 = smov %s871_s15 }
  0xdb   :  { %12 = sbr.rel (!%p10_p5) target bundleno = 2 (0x2), region = 62 }

// kernel: conv_bn_lrelu.2
= control target key start
LH: loop header
LB: loop body
LE: loop exit
PB: predicated region body
PF: predicated region fallthrough
CT: control target
= control target key end

     0   :  { %s1246_s12 = smov 0   ;;  %s1248_s13 = smov 0   ;;  %s1488_s0 = inlined_call_operand.vmem [shape: f32[512,128], index: 0, kind: input, shape index: {}]   ;;  %s1489_s1 = inlined_call_operand.vmem [shape: f32[128,128], index: 1, kind: input, shape index: {}]   ;;  %s1490_s2 = inlined_call_operand.vmem [shape: f32[512,128], index: 2, kind: output, shape index: {0}]   ;;  %s1491_s3 = inlined_call_operand.vmem [shape: f32[2,8,128], index: 3, kind: output, shape index: {1}]  }
   0x1   :  { %s1250_s14 = smov 0  }
   0x2 LB: > { %s33_s15 = sadd.s32 1, %s1220_s13  ;;  %p994_p0 = scmp.ge.s32.totalorder %s1224_s14, 1  ;;  %s1224_s14 = sphi %s1250_s14, %s14_s14   ;;  %s1220_s13 = sphi %s1248_s13, %s1493_s13   ;;  %s1216_s12 = sphi %s1246_s12, %s1492_s12  }
   0x3   : > { %p35_p1 = scmp.ge.s32.totalorder %s33_s15, 2  ;;  %p185_p2 = scmp.lt.s32.totalorder %s1224_s14, 3 }
   0x5   : > { %s1495_s15 = smov (%p35_p1, %s33_s15), 0  ;;  %p186_p3 = pnand %p994_p0, %p185_p2 }
   0x6   : > { %v364_v0 = vld [vmem:[%s1489_s1] sm:$0xff] (!%p186_p3)  ;;  %v365_v1 = vld [vmem:[%s1489_s1 + $0x8] sm:$0xff] (!%p186_p3)  ;;  %v366_v2 = vld [vmem:[%s1489_s1 + $0x10] sm:$0xff] (!%p186_p3)  ;;  %s995_s22 = sshll.u32 (!%p186_p3), %s1216_s12, 5  ;;  %p257_p5 = scmp.lt.s32.totalorder (!%p186_p3), %s1216_s12, 1 }
   0x7   : > { %189 = sbr.rel (%p186_p3) target bundleno = 335 (0x14f), region = 28  ;;  %v1130_v3 = vpack.c.bf16 (!%p186_p3), %v365_v1, %v364_v0  ;;  %v367_v4 = vld [vmem:[%s1489_s1 + $0x18] sm:$0xff] (!%p186_p3)  ;;  %p231_p4 = scmp.lt.s32.totalorder (!%p186_p3), %s995_s22, 63  ;;  %v368_v6 = vld [vmem:[%s1489_s1 + $0x20] sm:$0xff] (!%p186_p3)  ;;  %v369_v7 = vld [vmem:[%s1489_s1 + $0x28] sm:$0xff] (!%p186_p3) }
   0x8   : > { %v1134_v5 = vpack.c.bf16 (!%p186_p3), %v367_v4, %v366_v2  ;;  %v1138_v8 = vpack.c.bf16 (!%p186_p3), %v369_v7, %v368_v6  ;;  %v370_v9 = vld [vmem:[%s1489_s1 + $0x30] sm:$0xff] (!%p186_p3)  ;;  %v371_v10 = vld [vmem:[%s1489_s1 + $0x38] sm:$0xff] (!%p186_p3)  ;;  %v372_v13 = vld [vmem:[%s1489_s1 + $0x40] sm:$0xff] (!%p186_p3) }
   0x9   : > { %1131 = vmatprep.subr.bf16.mxu0 (!%p186_p3), %v1130_v3  ;;  %1162 = vmatprep.subr.bf16.mxu1 (!%p186_p3), %v1130_v3  ;;  %v1142_v12 = vpack.c.bf16 (!%p186_p3), %v371_v10, %v370_v9  ;;  %v373_v14 = vld [vmem:[%s1489_s1 + $0x48] sm:$0xff] (!%p186_p3)  ;;  %v374_v17 = vld [vmem:[%s1489_s1 + $0x50] sm:$0xff] (!%p186_p3)  ;;  %v375_v18 = vld [vmem:[%s1489_s1 + $0x58] sm:$0xff] (!%p186_p3) }
   0xa   : > { %1133 = vmatpush3.bf16.msra.mxu0 (!%p186_p3), %v1130_v3  ;;  %1170 = vmatpush3.bf16.msra.mxu1 (!%p186_p3), %v1130_v3  ;;  %v1146_v16 = vpack.c.bf16 (!%p186_p3), %v373_v14, %v372_v13  ;;  %v1150_v19 = vpack.c.bf16 (!%p186_p3), %v375_v18, %v374_v17  ;;  %v376_v20 = vld [vmem:[%s1489_s1 + $0x60] sm:$0xff] (!%p186_p3)  ;;  %v377_v21 = vld [vmem:[%s1489_s1 + $0x68] sm:$0xff] (!%p186_p3)  ;;  %v378_v23 = vld [vmem:[%s1489_s1 + $0x70] sm:$0xff] (!%p186_p3) }
   0xb   : > { %1135 = vmatprep.subr.bf16.mxu0 (!%p186_p3), %v1134_v5  ;;  %1163 = vmatprep.subr.bf16.mxu1 (!%p186_p3), %v1134_v5  ;;  %v1154_v22 = vpack.c.bf16 (!%p186_p3), %v377_v21, %v376_v20  ;;  %v379_v24 = vld [vmem:[%s1489_s1 + $0x78] sm:$0xff] (!%p186_p3) }
   0xc   : > { %v1158_v25 = vpack.c.bf16 (!%p186_p3), %v379_v24, %v378_v23 }
   0xe   : > { %s1497_s22 = smov (!%p231_p4, %s995_s22), 63  ;;  %1137 = vmatpush3.bf16.msra.mxu0 %v1134_v5  ;;  %1171 = vmatpush3.bf16.msra.mxu1 %v1134_v5  ;;  %s1499_s12 = smov (!%p257_p5, %s1216_s12), 1 }
   0xf   : > { %s996_s29 = sshll.u32 %s1497_s22, 3  ;;  %1139 = vmatprep.subr.bf16.mxu0 %v1138_v8  ;;  %1164 = vmatprep.subr.bf16.mxu1 %v1138_v8  ;;  %s999_s22 = sshll.u32 %s1499_s12, 3 }
  0x10   : > { %s1299_s9 = scalar_lea.vmem %s1488_s0, %s996_s29  ;;  %s1362_s7 = scalar_lea.vmem %s1490_s2, %s996_s29 }
  0x11   : > { %v332_v11 = vld [vmem:[%s1299_s9] sm:$0xff]  ;;  %v333_v26 = vld [vmem:[%s1299_s9 + $0x8] sm:$0xff]  ;;  %v334_v27 = vld [vmem:[%s1299_s9 + $0x10] sm:$0xff] }
  0x12   : > { %1082 = vmatprep.mubr.f32.mxu0 %v332_v11  ;;  %1141 = vmatpush3.bf16.msra.mxu0 %v1138_v8  ;;  %v348_v15 = vld [vmem:[%s1299_s9 + $0x80] sm:$0xff]  ;;  %v349_v28 = vld [vmem:[%s1299_s9 + $0x88] sm:$0xff]  ;;  %v350_v29 = vld [vmem:[%s1299_s9 + $0x90] sm:$0xff] }
  0x13   : > { %1143 = vmatprep.subr.bf16.mxu0 %v1142_v12  ;;  %1172 = vmatpush3.bf16.msra.mxu1 %v1138_v8  ;;  %v335_v30 = vld [vmem:[%s1299_s9 + $0x18] sm:$0xff]  ;;  %v336_v31 = vld [vmem:[%s1299_s9 + $0x20] sm:$0xff]  ;;  %v337_v34 = vld [vmem:[%s1299_s9 + $0x28] sm:$0xff] }
  0x14   : > { %1165 = vmatprep.subr.bf16.mxu1 %v1142_v12  ;;  %1106 = vmatprep.mubr.f32.mxu1 %v348_v15  ;;  %v351_v32 = vld [vmem:[%s1299_s9 + $0x98] sm:$0xff]  ;;  %v352_v33 = vld [vmem:[%s1299_s9 + $0xa0] sm:$0xff]  ;;  %v338_v35 = vld [vmem:[%s1299_s9 + $0x30] sm:$0xff] }
  0x15   : > { %v353_v36 = vld [vmem:[%s1299_s9 + $0xa8] sm:$0xff]  ;;  %v354_v37 = vld [vmem:[%s1299_s9 + $0xb0] sm:$0xff]  ;;  %v339_v38 = vld [vmem:[%s1299_s9 + $0x38] sm:$0xff] }
  0x16   : > { %1145 = vmatpush3.bf16.msra.mxu0 %v1142_v12  ;;  %v340_v39 = vld [vmem:[%s1299_s9 + $0x40] sm:$0xff]  ;;  %v355_v40 = vld [vmem:[%s1299_s9 + $0xb8] sm:$0xff]  ;;  %v341_v42 = vld [vmem:[%s1299_s9 + $0x48] sm:$0xff] }
  0x17   : > { %1147 = vmatprep.subr.bf16.mxu0 %v1146_v16  ;;  %1173 = vmatpush3.bf16.msra.mxu1 %v1142_v12  ;;  %v356_v41 = vld [vmem:[%s1299_s9 + $0xc0] sm:$0xff]  ;;  %v342_v43 = vld [vmem:[%s1299_s9 + $0x50] sm:$0xff]  ;;  %v357_v44 = vld [vmem:[%s1299_s9 + $0xc8] sm:$0xff] }
  0x18   : > { %1166 = vmatprep.subr.bf16.mxu1 %v1146_v16  ;;  %v358_v45 = vld [vmem:[%s1299_s9 + $0xd0] sm:$0xff]  ;;  %v343_v46 = vld [vmem:[%s1299_s9 + $0x58] sm:$0xff]  ;;  %v344_v47 = vld [vmem:[%s1299_s9 + $0x60] sm:$0xff] }
  0x19   : > { %v359_v48 = vld [vmem:[%s1299_s9 + $0xd8] sm:$0xff]  ;;  %v360_v49 = vld [vmem:[%s1299_s9 + $0xe0] sm:$0xff]  ;;  %v345_v50 = vld [vmem:[%s1299_s9 + $0x68] sm:$0xff] }
  0x1a   : > { %1149 = vmatpush3.bf16.msra.mxu0 %v1146_v16  ;;  %v346_v51 = vld [vmem:[%s1299_s9 + $0x70] sm:$0xff]  ;;  %v361_v52 = vld [vmem:[%s1299_s9 + $0xe8] sm:$0xff]  ;;  %v347_v54 = vld [vmem:[%s1299_s9 + $0x78] sm:$0xff] }
  0x1b   : > { %1151 = vmatprep.subr.bf16.mxu0 %v1150_v19  ;;  %1174 = vmatpush3.bf16.msra.mxu1 %v1146_v16  ;;  %v362_v53 = vld [vmem:[%s1299_s9 + $0xf0] sm:$0xff]  ;;  %v363_v55 = vld [vmem:[%s1299_s9 + $0xf8] sm:$0xff]  ;;  %s263_s9 = scalar_lea.vmem %s1491_s3, %s999_s22 }
  0x1c   : > { %1167 = vmatprep.subr.bf16.mxu1 %v1150_v19 }
  0x1e   : > { %1153 = vmatpush3.bf16.msra.mxu0 %v1150_v19 }
  0x1f   : > { %1155 = vmatprep.subr.bf16.mxu0 %v1154_v22  ;;  %1175 = vmatpush3.bf16.msra.mxu1 %v1150_v19 }
  0x20   : > { %1168 = vmatprep.subr.bf16.mxu1 %v1154_v22 }
  0x22   : > { %1157 = vmatpush3.bf16.msra.mxu0 %v1154_v22 }
  0x23   : > { %1159 = vmatprep.subr.bf16.mxu0 %v1158_v25  ;;  %1176 = vmatpush3.bf16.msra.mxu1 %v1154_v22 }
  0x24   : > { %1169 = vmatprep.subr.bf16.mxu1 %v1158_v25 }
  0x26   : > { %1161 = vmatpush3.bf16.msra.mxu0 %v1158_v25 }
  0x27   : > { %1177 = vmatpush3.bf16.msra.mxu1 %v1158_v25 }
  0x29   : > { %1083 = vmatmul.mubr.f32.vlgmr.msra.gmra.mrb[0].mxu0 %v333_v26 }
  0x2a   : > { %1085 = vmatprep.mubr.f32.mxu0 %v334_v27  ;;  %1107 = vmatmul.mubr.f32.vlgmr.msra.gmra.mrb[0].mxu1 %v349_v28 }
  0x2b   : > { %1109 = vmatprep.mubr.f32.mxu1 %v350_v29 }
  0x2d   : > { %1086 = vmatmul.mubr.f32.gmra.mrb[2].mxu0 %v335_v30 }
  0x2e   : > { %1088 = vmatprep.mubr.f32.mxu0 %v336_v31  ;;  %1110 = vmatmul.mubr.f32.gmra.mrb[2].mxu1 %v351_v32 }
  0x2f   : > { %1112 = vmatprep.mubr.f32.mxu1 %v352_v33 }
  0x31   : > { %1089 = vmatmul.mubr.f32.gmra.mrb[4].mxu0 %v337_v34 }
  0x32   : > { %1091 = vmatprep.mubr.f32.mxu0 %v338_v35  ;;  %1113 = vmatmul.mubr.f32.gmra.mrb[4].mxu1 %v353_v36 }
  0x33   : > { %1115 = vmatprep.mubr.f32.mxu1 %v354_v37 }
  0x35   : > { %1092 = vmatmul.mubr.f32.gmra.mrb[6].mxu0 %v339_v38 }
  0x36   : > { %1094 = vmatprep.mubr.f32.mxu0 %v340_v39  ;;  %1116 = vmatmul.mubr.f32.gmra.mrb[6].mxu1 %v355_v40 }
  0x37   : > { %1118 = vmatprep.mubr.f32.mxu1 %v356_v41 }
  0x39   : > { %1095 = vmatmul.mubr.f32.gmra.mrb[8].mxu0 %v341_v42 }
  0x3a   : > { %1097 = vmatprep.mubr.f32.mxu0 %v342_v43  ;;  %1119 = vmatmul.mubr.f32.gmra.mrb[8].mxu1 %v357_v44 }
  0x3b   : > { %1121 = vmatprep.mubr.f32.mxu1 %v358_v45 }
  0x3d   : > { %1098 = vmatmul.mubr.f32.gmra.mrb[10].mxu0 %v343_v46 }
  0x3e   : > { %1100 = vmatprep.mubr.f32.mxu0 %v344_v47  ;;  %1122 = vmatmul.mubr.f32.gmra.mrb[10].mxu1 %v359_v48 }
  0x3f   : > { %1124 = vmatprep.mubr.f32.mxu1 %v360_v49 }
  0x41   : > { %1101 = vmatmul.mubr.f32.gmra.mrb[12].mxu0 %v345_v50 }
  0x42   : > { %1103 = vmatprep.mubr.f32.mxu0 %v346_v51  ;;  %1125 = vmatmul.mubr.f32.gmra.mrb[12].mxu1 %v361_v52 }
  0x43   : > { %1127 = vmatprep.mubr.f32.mxu1 %v362_v53 }
  0x45   : > { %1104 = vmatmul.mubr.f32.gmra.mrb[14].mxu0 %v347_v54 }
  0x46   : > { %1128 = vmatmul.mubr.f32.gmra.mrb[14].mxu1 %v363_v55 }
  0xfc   : > { %v1084_v56 = vpop.f32.mrb[0].mxu0 }
  0xfd   : > { %705 = vst [vmem:[%s1362_s7 + $0x8] sm:$0xff] %v1084_v56  ;;  %v774_v57 = vmul.f32 %v1084_v56, %v1084_v56  ;;  %v446_v58 = vpop.f32.mrb[1].mxu0  ;;  %v1365_v59 = vpop.f32.mrb[0].mxu1 }
  0xfe   : > { %704 = vst [vmem:[%s1362_s7] sm:$0xff] %v446_v58  ;;  %v736_v60 = vadd.f32 %v1084_v56, %v446_v58  ;;  %v773_v61 = vmul.f32 %v446_v58, %v446_v58  ;;  %721 = vst [vmem:[%s1362_s7 + $0x88] sm:$0xff] %v1365_v59  ;;  %v1370_v62 = vpop.f32.mrb[1].mxu1 }
  0xff   : > { %720 = vst [vmem:[%s1362_s7 + $0x80] sm:$0xff] %v1370_v62 }
 0x100   : > { %v805_v63 = vadd.f32 %v774_v57, %v773_v61  ;;  %v1087_v0 = vpop.f32.mrb[2].mxu0 }
 0x101   : > { %707 = vst [vmem:[%s1362_s7 + $0x18] sm:$0xff] %v1087_v0  ;;  %v456_v1 = vpop.f32.mrb[3].mxu0  ;;  %v1375_v2 = vpop.f32.mrb[2].mxu1  ;;  %v776_v6 = vmul.f32 %v1087_v0, %v1087_v0 }
 0x102   : > { %706 = vst [vmem:[%s1362_s7 + $0x10] sm:$0xff] %v456_v1  ;;  %v737_v3 = vadd.f32 %v736_v60, %v456_v1  ;;  %v775_v4 = vmul.f32 %v456_v1, %v456_v1  ;;  %723 = vst [vmem:[%s1362_s7 + $0x98] sm:$0xff] %v1375_v2  ;;  %v1380_v5 = vpop.f32.mrb[3].mxu1 }
 0x103   : > { %722 = vst [vmem:[%s1362_s7 + $0x90] sm:$0xff] %v1380_v5 }
 0x104   : > { %v806_v7 = vadd.f32 %v805_v63, %v775_v4  ;;  %v1090_v8 = vpop.f32.mrb[4].mxu0  ;;  %v738_v9 = vadd.f32 %v1087_v0, %v737_v3 }
 0x105   : > { %709 = vst [vmem:[%s1362_s7 + $0x28] sm:$0xff] %v1090_v8  ;;  %v466_v10 = vpop.f32.mrb[5].mxu0  ;;  %v1385_v11 = vpop.f32.mrb[4].mxu1  ;;  %v778_v16 = vmul.f32 %v1090_v8, %v1090_v8 }
 0x106   : > { %708 = vst [vmem:[%s1362_s7 + $0x20] sm:$0xff] %v466_v10  ;;  %v739_v12 = vadd.f32 %v738_v9, %v466_v10  ;;  %v777_v13 = vmul.f32 %v466_v10, %v466_v10  ;;  %v807_v14 = vadd.f32 %v806_v7, %v776_v6  ;;  %725 = vst [vmem:[%s1362_s7 + $0xa8] sm:$0xff] %v1385_v11  ;;  %v1390_v15 = vpop.f32.mrb[5].mxu1 }
 0x107   : > { %724 = vst [vmem:[%s1362_s7 + $0xa0] sm:$0xff] %v1390_v15  ;;  %v789_v9 = vmul.f32 %v1370_v62, %v1370_v62 }
 0x108   : > { %v808_v17 = vadd.f32 %v807_v14, %v777_v13  ;;  %v1093_v18 = vpop.f32.mrb[6].mxu0  ;;  %v740_v19 = vadd.f32 %v1090_v8, %v739_v12  ;;  %v790_v13 = vmul.f32 %v1365_v59, %v1365_v59 }
 0x109   : > { %711 = vst [vmem:[%s1362_s7 + $0x38] sm:$0xff] %v1093_v18  ;;  %v476_v20 = vpop.f32.mrb[7].mxu0  ;;  %v1395_v21 = vpop.f32.mrb[6].mxu1  ;;  %v780_v26 = vmul.f32 %v1093_v18, %v1093_v18 }
 0x10a   : > { %710 = vst [vmem:[%s1362_s7 + $0x30] sm:$0xff] %v476_v20  ;;  %v741_v22 = vadd.f32 %v740_v19, %v476_v20  ;;  %v779_v23 = vmul.f32 %v476_v20, %v476_v20  ;;  %v809_v24 = vadd.f32 %v808_v17, %v778_v16  ;;  %727 = vst [vmem:[%s1362_s7 + $0xb8] sm:$0xff] %v1395_v21  ;;  %v1400_v25 = vpop.f32.mrb[7].mxu1 }
 0x10b   : > { %726 = vst [vmem:[%s1362_s7 + $0xb0] sm:$0xff] %v1400_v25  ;;  %v791_v17 = vmul.f32 %v1380_v5, %v1380_v5  ;;  %v792_v20 = vmul.f32 %v1375_v2, %v1375_v2 }
 0x10c   : > { %v810_v27 = vadd.f32 %v809_v24, %v779_v23  ;;  %v1096_v28 = vpop.f32.mrb[8].mxu0  ;;  %v742_v29 = vadd.f32 %v1093_v18, %v741_v22 }
 0x10d   : > { %713 = vst [vmem:[%s1362_s7 + $0x48] sm:$0xff] %v1096_v28  ;;  %v486_v30 = vpop.f32.mrb[9].mxu0  ;;  %v1405_v31 = vpop.f32.mrb[8].mxu1  ;;  %v782_v36 = vmul.f32 %v1096_v28, %v1096_v28 }
 0x10e   : > { %712 = vst [vmem:[%s1362_s7 + $0x40] sm:$0xff] %v486_v30  ;;  %v743_v32 = vadd.f32 %v742_v29, %v486_v30  ;;  %v781_v33 = vmul.f32 %v486_v30, %v486_v30  ;;  %v811_v34 = vadd.f32 %v810_v27, %v780_v26  ;;  %729 = vst [vmem:[%s1362_s7 + $0xc8] sm:$0xff] %v1405_v31  ;;  %v1410_v35 = vpop.f32.mrb[9].mxu1 }
 0x10f   : > { %728 = vst [vmem:[%s1362_s7 + $0xc0] sm:$0xff] %v1410_v35 }
 0x110   : > { %v812_v37 = vadd.f32 %v811_v34, %v781_v33  ;;  %v1099_v38 = vpop.f32.mrb[10].mxu0  ;;  %v744_v39 = vadd.f32 %v1096_v28, %v743_v32 }
 0x111   : > { %715 = vst [vmem:[%s1362_s7 + $0x58] sm:$0xff] %v1099_v38  ;;  %v496_v40 = vpop.f32.mrb[11].mxu0  ;;  %v1415_v41 = vpop.f32.mrb[10].mxu1  ;;  %v784_v46 = vmul.f32 %v1099_v38, %v1099_v38 }
 0x112   : > { %714 = vst [vmem:[%s1362_s7 + $0x50] sm:$0xff] %v496_v40  ;;  %v745_v42 = vadd.f32 %v744_v39, %v496_v40  ;;  %v783_v43 = vmul.f32 %v496_v40, %v496_v40  ;;  %v813_v44 = vadd.f32 %v812_v37, %v782_v36  ;;  %731 = vst [vmem:[%s1362_s7 + $0xd8] sm:$0xff] %v1415_v41  ;;  %v1420_v45 = vpop.f32.mrb[11].mxu1 }
 0x113   : > { %730 = vst [vmem:[%s1362_s7 + $0xd0] sm:$0xff] %v1420_v45 }
 0x114   : > { %v814_v47 = vadd.f32 %v813_v44, %v783_v43  ;;  %v1102_v48 = vpop.f32.mrb[12].mxu0  ;;  %v746_v49 = vadd.f32 %v1099_v38, %v745_v42 }
 0x115   : > { %717 = vst [vmem:[%s1362_s7 + $0x68] sm:$0xff] %v1102_v48  ;;  %v506_v50 = vpop.f32.mrb[13].mxu0  ;;  %v1425_v51 = vpop.f32.mrb[12].mxu1  ;;  %v786_v56 = vmul.f32 %v1102_v48, %v1102_v48 }
 0x116   : > { %716 = vst [vmem:[%s1362_s7 + $0x60] sm:$0xff] %v506_v50  ;;  %v747_v52 = vadd.f32 %v746_v49, %v506_v50  ;;  %v785_v53 = vmul.f32 %v506_v50, %v506_v50  ;;  %v815_v54 = vadd.f32 %v814_v47, %v784_v46  ;;  %733 = vst [vmem:[%s1362_s7 + $0xe8] sm:$0xff] %v1425_v51  ;;  %v586_v55 = vpop.f32.mrb[13].mxu1 }
 0x117   : > { %732 = vst [vmem:[%s1362_s7 + $0xe0] sm:$0xff] %v586_v55  ;;  %v801_v43 = vmul.f32 %v586_v55, %v586_v55  ;;  %v802_v47 = vmul.f32 %v1425_v51, %v1425_v51 }
 0x118   : > { %v816_v57 = vadd.f32 %v815_v54, %v785_v53  ;;  %v1105_v58 = vpop.f32.mrb[14].mxu0  ;;  %v748_v60 = vadd.f32 %v1102_v48, %v747_v52 }
 0x119   : > { %719 = vst [vmem:[%s1362_s7 + $0x78] sm:$0xff] %v1105_v58  ;;  %v516_v61 = vpop.f32.mrb[15].mxu0  ;;  %v1129_v63 = vpop.f32.mrb[14].mxu1  ;;  %v788_v6 = vmul.f32 %v1105_v58, %v1105_v58 }
 0x11a   : > { %718 = vst [vmem:[%s1362_s7 + $0x70] sm:$0xff] %v516_v61  ;;  %v749_v0 = vadd.f32 %v748_v60, %v516_v61  ;;  %v787_v1 = vmul.f32 %v516_v61, %v516_v61  ;;  %v817_v3 = vadd.f32 %v816_v57, %v786_v56  ;;  %735 = vst [vmem:[%s1362_s7 + $0xf8] sm:$0xff] %v1129_v63  ;;  %v596_v4 = vpop.f32.mrb[15].mxu1 }
 0x11b   : > { %734 = vst [vmem:[%s1362_s7 + $0xf0] sm:$0xff] %v596_v4  ;;  %v803_v49 = vmul.f32 %v596_v4, %v596_v4  ;;  %v804_v52 = vmul.f32 %v1129_v63, %v1129_v63 }
 0x11c   : > { %v750_v7 = vadd.f32 %v1105_v58, %v749_v0  ;;  %v818_v8 = vadd.f32 %v817_v3, %v787_v1 }
 0x11e   : > { %v819_v10 = vadd.f32 %v818_v8, %v788_v6  ;;  %v751_v12 = vadd.f32 %v750_v7, %v1370_v62  ;;  %v793_v62 = vmul.f32 %v1390_v15, %v1390_v15 }
 0x120   : > { %v820_v14 = vadd.f32 %v819_v10, %v789_v9  ;;  %v752_v16 = vadd.f32 %v1365_v59, %v751_v12  ;;  %v794_v59 = vmul.f32 %v1385_v11, %v1385_v11 }
 0x122   : > { %v753_v18 = vadd.f32 %v752_v16, %v1380_v5  ;;  %v821_v19 = vadd.f32 %v820_v14, %v790_v13  ;;  %v795_v5 = vmul.f32 %v1400_v25, %v1400_v25 }
 0x124   : > { %v822_v22 = vadd.f32 %v821_v19, %v791_v17  ;;  %v754_v23 = vadd.f32 %v1375_v2, %v753_v18  ;;  %v796_v2 = vmul.f32 %v1395_v21, %v1395_v21 }
 0x126   : > { %v755_v24 = vadd.f32 %v754_v23, %v1390_v15  ;;  %v823_v26 = vadd.f32 %v822_v22, %v792_v20  ;;  %v797_v15 = vmul.f32 %v1410_v35, %v1410_v35 }
 0x128   : > { %v824_v27 = vadd.f32 %v823_v26, %v793_v62  ;;  %v756_v28 = vadd.f32 %v1385_v11, %v755_v24  ;;  %v798_v11 = vmul.f32 %v1405_v31, %v1405_v31 }
 0x12a   : > { %v757_v29 = vadd.f32 %v756_v28, %v1400_v25  ;;  %v825_v30 = vadd.f32 %v824_v27, %v794_v59  ;;  %v799_v25 = vmul.f32 %v1420_v45, %v1420_v45 }
 0x12c   : > { %v826_v32 = vadd.f32 %v825_v30, %v795_v5  ;;  %v758_v33 = vadd.f32 %v1395_v21, %v757_v29  ;;  %v800_v21 = vmul.f32 %v1415_v41, %v1415_v41 }
 0x12e   : > { %v759_v34 = vadd.f32 %v758_v33, %v1410_v35  ;;  %v827_v36 = vadd.f32 %v826_v32, %v796_v2 }
 0x130   : > { %v828_v37 = vadd.f32 %v827_v36, %v797_v15  ;;  %v760_v38 = vadd.f32 %v1405_v31, %v759_v34 }
 0x132   : > { %v761_v39 = vadd.f32 %v760_v38, %v1420_v45  ;;  %v829_v40 = vadd.f32 %v828_v37, %v798_v11 }
 0x134   : > { %v830_v42 = vadd.f32 %v829_v40, %v799_v25  ;;  %v762_v35 = vadd.f32 %v1415_v41, %v761_v39 }
 0x136   : > { %v763_v44 = vadd.f32 %v762_v35, %v586_v55  ;;  %v831_v46 = vadd.f32 %v830_v42, %v800_v21  ;;  %v842_v55 = vlaneseq }
 0x138   : > { %v832_v31 = vadd.f32 %v831_v46, %v801_v43  ;;  %v764_v48 = vadd.f32 %v1425_v51, %v763_v44  ;;  %v843_v3 = vshrl.u32 %v842_v55, 7 }
 0x13a   : > { %v765_v45 = vadd.f32 %v764_v48, %v596_v4  ;;  %v833_v50 = vadd.f32 %v832_v31, %v802_v47  ;;  %vm845_vm0 = vcmp.eq.s32.totalorder %v843_v3, 1  ;;  %vm844_vm1 = vcmp.eq.s32.totalorder %v843_v3, 0 }
 0x13c   : > { %v766_v53 = vadd.f32 %v1129_v63, %v765_v45  ;;  %v834_v54 = vadd.f32 %v833_v50, %v803_v49 }
 0x13e   : > { %v767_v56 = vrot.slane %v766_v53, 4  ;;  %v835_v57 = vadd.f32 %v834_v54, %v804_v52 }
 0x140   : > { %v768_v41 = vadd.f32 %v767_v56, %v766_v53  ;;  %v836_v58 = vrot.slane %v835_v57, 4 }
 0x142   : > { %v769_v60 = vrot.slane %v768_v41, 2  ;;  %v837_v61 = vadd.f32 %v836_v58, %v835_v57 }
 0x144   : > { %v770_v0 = vadd.f32 %v769_v60, %v768_v41  ;;  %v838_v1 = vrot.slane %v837_v61, 2 }
 0x146   : > { %v839_v6 = vadd.f32 %v838_v1, %v837_v61  ;;  %v771_v51 = vrot.slane %v770_v0, 1 }
 0x148   : > { %v840_v4 = vrot.slane %v839_v6, 1  ;;  %v772_v63 = vadd.f32 %v771_v51, %v770_v0 }
 0x14a   : > { %v841_v7 = vadd.f32 %v840_v4, %v839_v6 }
 0x14c   : > { %v846_v8 = vsel %vm845_vm0, %v841_v7, 0.0 }
 0x14d   : > { %v847_v9 = vsel %vm844_vm1, %v772_v63, %v846_v8 }
 0x14e   : > { %848 = vst [vmem:[%s263_s9] sm:$0xff] %v847_v9 }
 0x14f PF: > { %s14_s14 = sadd.s32 1, %s1224_s14   ;;  %s1492_s12 = smov %s1220_s13 }
 0x150   : > { %p11_p6 = scmp.ge.s32.totalorder %s14_s14, 4   ;;  %s1493_s13 = smov %s1495_s15 }
 0x152   :  { %13 = sbr.rel (!%p11_p6) target bundleno = 2 (0x2), region = 81 }

</bundles_post_ra>
